<compile_context>
chip_gen: v5e
topology: v5e:2x2
jax: 0.10.0
libtpu: 0.0.40
codegen_flags: <defaults>
</compile_context>

<pallas_src>
import functools

import jax
import jax.numpy as jnp
from jax.experimental import pallas as pl
from jax.experimental.pallas import tpu as pltpu


def _round_up(x: int, m: int) -> int:
    return (x + m - 1) // m * m


def _vae_encoder_kernel(x_ref, eps_ref,
                        w1_ref, b1_ref, w2_ref, b2_ref,
                        wh_ref, bh_ref,
                        out_ref, *, zp: int, compute_dtype):
    cdt = compute_dtype
    x = x_ref[...].astype(cdt)

    # --- MLP encoder: Linear -> ReLU -> Linear (f32 accumulation on the MXU) -
    h = jnp.dot(x, w1_ref[...], preferred_element_type=jnp.float32) + b1_ref[...]
    h = jnp.maximum(h, 0.0)                                    # ReLU in f32 (VPU)
    x_enc = jnp.dot(h.astype(cdt), w2_ref[...],
                    preferred_element_type=jnp.float32) + b2_ref[...]

    # --- fused heads: single (H, 2*ZP) matmul -> [ logvar | mu ] -------------
    heads = jnp.dot(x_enc.astype(cdt), wh_ref[...],
                    preferred_element_type=jnp.float32) + bh_ref[...]
    logvar = heads[:, :zp]          # 128-aligned static slice (cheap)
    mu = heads[:, zp:]

    # --- reparameterization trick (f32; exp goes to the EUP) -----------------
    sigma = jnp.exp(0.5 * logvar)
    z = mu + eps_ref[...] * sigma

    # --- lane-dense, 128-aligned stores: [ z | logvar | mu ] ------------------
    out_ref[:, 0:zp] = z.astype(out_ref.dtype)
    out_ref[:, zp:3 * zp] = heads.astype(out_ref.dtype)


def variational_encoder(x, epsilon, params, *, tile_b: int = 256,
                        compute_dtype=jnp.float32):
    """x: (B, input_dim) f32, epsilon: (B, z_dim) f32, params: dict of weights.

    Returns (z, logvar, mu), each (B, z_dim) f32.
    compute_dtype: jnp.float32 (exact) or jnp.bfloat16 (matmul inputs only;
    accumulation and elementwise math stay f32).
    """
    B, D_in = x.shape
    H = params["w1"].shape[1]
    Z = params["wmu"].shape[1]
    ZP = _round_up(Z, 128)          # lane-dense head / output width
    cdt = compute_dtype

    # ---- pack / cast weights (cheap; fuses into surrounding XLA program) ----
    w1 = params["w1"].astype(cdt)
    w2 = params["w2"].astype(cdt)
    b1 = params["b1"].astype(jnp.float32)
    b2 = params["b2"].astype(jnp.float32)
    # Fused + lane-padded head weights: columns [0:Z] = logvar, [ZP:ZP+Z] = mu.
    wh = jnp.zeros((H, 2 * ZP), cdt)
    wh = wh.at[:, :Z].set(params["wlv"].astype(cdt))
    wh = wh.at[:, ZP:ZP + Z].set(params["wmu"].astype(cdt))
    bh = jnp.zeros((1, 2 * ZP), jnp.float32)
    bh = bh.at[:, :Z].set(params["blv"].astype(jnp.float32))
    bh = bh.at[:, ZP:ZP + Z].set(params["bmu"].astype(jnp.float32))

    # ---- batch tiling (pad B so every grid step is a full tile) -------------
    TILE_B = min(tile_b, _round_up(B, 8))          # multiple of 8 (sublanes)
    Bp = _round_up(B, TILE_B)
    xp = jnp.pad(x, ((0, Bp - B), (0, 0))).astype(cdt)
    eps_p = jnp.zeros((Bp, ZP), jnp.float32).at[:B, :Z].set(epsilon)

    grid = (Bp // TILE_B,)

    # ---- advisory cost estimate ----------------------------------------------
    flops = 2 * Bp * (D_in * H + H * H + H * 2 * ZP)
    transcendentals = Bp * ZP                                  # exp(0.5*logvar)
    bytes_accessed = sum(int(a.size) * a.dtype.itemsize
                         for a in (xp, eps_p, w1, b1, w2, b2, wh, bh))
    bytes_accessed += Bp * 3 * ZP * 4                          # output slab

    kernel = functools.partial(_vae_encoder_kernel, zp=ZP, compute_dtype=cdt)

    # NOTE: for production sizes (hidden_dim >~ 2K, esp. v7x's 64 MiB VMEM) the
    # weight-resident layout should switch to a K-tiled reduction grid axis with an
    # f32 VMEM accumulator + pl.when init/finalize and an explicit vmem_limit_bytes.
    out = pl.pallas_call(
        kernel,
        out_shape=jax.ShapeDtypeStruct((Bp, 3 * ZP), jnp.float32),
        grid_spec=pltpu.PrefetchScalarGridSpec(
            num_scalar_prefetch=0,
            grid=grid,
            in_specs=[
                pl.BlockSpec((TILE_B, D_in), lambda i: (i, 0)),   # x   (batch-tiled)
                pl.BlockSpec((TILE_B, ZP), lambda i: (i, 0)),     # eps (lane-padded)
                pl.BlockSpec((D_in, H), lambda i: (0, 0)),        # w1  (VMEM-resident)
                pl.BlockSpec((1, H), lambda i: (0, 0)),           # b1
                pl.BlockSpec((H, H), lambda i: (0, 0)),           # w2
                pl.BlockSpec((1, H), lambda i: (0, 0)),           # b2
                pl.BlockSpec((H, 2 * ZP), lambda i: (0, 0)),      # fused heads W
                pl.BlockSpec((1, 2 * ZP), lambda i: (0, 0)),      # fused heads b
            ],
            out_specs=pl.BlockSpec((TILE_B, 3 * ZP), lambda i: (i, 0)),
        ),
        compiler_params=pltpu.CompilerParams(
            dimension_semantics=("parallel",)),    # batch tiles are independent
        cost_estimate=pl.CostEstimate(
            flops=flops,
            transcendentals=transcendentals,
            bytes_accessed=bytes_accessed),
    )(xp, eps_p, w1, b1, w2, b2, wh, bh)

    z = out[:B, 0:Z]
    logvar = out[:B, ZP:ZP + Z]
    mu = out[:B, 2 * ZP:2 * ZP + Z]
    return z, logvar, mu


def init_params(key, input_dim, hidden_dim, z_dim):
    ks = jax.random.split(key, 8)
    scale = lambda fan_in: 1.0 / jnp.sqrt(jnp.float32(fan_in))
    return {
        "w1":  jax.random.uniform(ks[0], (input_dim, hidden_dim), jnp.float32,
                                  -scale(input_dim), scale(input_dim)),
        "b1":  jax.random.uniform(ks[1], (1, hidden_dim), jnp.float32,
                                  -scale(input_dim), scale(input_dim)),
        "w2":  jax.random.uniform(ks[2], (hidden_dim, hidden_dim), jnp.float32,
                                  -scale(hidden_dim), scale(hidden_dim)),
        "b2":  jax.random.uniform(ks[3], (1, hidden_dim), jnp.float32,
                                  -scale(hidden_dim), scale(hidden_dim)),
        "wlv": jax.random.uniform(ks[4], (hidden_dim, z_dim), jnp.float32,
                                  -scale(hidden_dim), scale(hidden_dim)),
        "blv": jax.random.uniform(ks[5], (1, z_dim), jnp.float32,
                                  -scale(hidden_dim), scale(hidden_dim)),
        "wmu": jax.random.uniform(ks[6], (hidden_dim, z_dim), jnp.float32,
                                  -scale(hidden_dim), scale(hidden_dim)),
        "bmu": jax.random.uniform(ks[7], (1, z_dim), jnp.float32,
                                  -scale(hidden_dim), scale(hidden_dim)),
    }


def reference_forward(x, epsilon, p, compute_dtype=jnp.float32):
    cdt = compute_dtype

    def lin(a, w, b):
        return (jnp.dot(a.astype(cdt), w.astype(cdt),
                        preferred_element_type=jnp.float32)
                + b.astype(jnp.float32))

    h = jnp.maximum(lin(x, p["w1"], p["b1"]), 0.0)
    xe = lin(h, p["w2"], p["b2"])
    logvar = lin(xe, p["wlv"], p["blv"])
    mu = lin(xe, p["wmu"], p["bmu"])
    z = mu + epsilon * jnp.exp(0.5 * logvar)
    return z, logvar, mu


if __name__ == "__main__":
    key = jax.random.PRNGKey(0)

    # Small shapes consistent with VariationalEncoder(input_dim, hidden_dim, z_dim).
    B, INPUT_DIM, HIDDEN_DIM, Z_DIM = 8, 64, 32, 8
    k_param, k_x, k_eps, k_x2, k_eps2 = jax.random.split(key, 5)

    params = init_params(k_param, INPUT_DIM, HIDDEN_DIM, Z_DIM)
    x = jax.random.normal(k_x, (B, INPUT_DIM), jnp.float32)
    eps = jax.random.normal(k_eps, (B, Z_DIM), jnp.float32)   # torch.randn_like(mu)

    # 1) f32 path: exact parity with the reference.
    z, logvar, mu = variational_encoder(x, eps, params)
    jax.block_until_ready((z, logvar, mu))
    z_r, lv_r, mu_r = reference_forward(x, eps, params)
    assert jnp.allclose(z, z_r, atol=1e-4, rtol=1e-4)
    assert jnp.allclose(logvar, lv_r, atol=1e-4, rtol=1e-4)
    assert jnp.allclose(mu, mu_r, atol=1e-4, rtol=1e-4)

    # 2) larger, non-multiple batch: exercises batch tiling + padding + parallel grid.
    B2 = 300
    x2 = jax.random.normal(k_x2, (B2, INPUT_DIM), jnp.float32)
    eps2 = jax.random.normal(k_eps2, (B2, Z_DIM), jnp.float32)
    z2, lv2, mu2 = variational_encoder(x2, eps2, params, tile_b=128)
    jax.block_until_ready((z2, lv2, mu2))
    z2_r, lv2_r, mu2_r = reference_forward(x2, eps2, params)
    assert jnp.allclose(z2, z2_r, atol=1e-4, rtol=1e-4)
    assert jnp.allclose(lv2, lv2_r, atol=1e-4, rtol=1e-4)
    assert jnp.allclose(mu2, mu2_r, atol=1e-4, rtol=1e-4)

    # 3) bf16 matmul-input path (v6e/v7x native MXU dtype), compared against a
    #    reference using the same bf16 casts (loose tolerance for rounding-order).
    z3, lv3, mu3 = variational_encoder(x, eps, params, compute_dtype=jnp.bfloat16)
    jax.block_until_ready((z3, lv3, mu3))
    z3_r, lv3_r, mu3_r = reference_forward(x, eps, params, compute_dtype=jnp.bfloat16)
    assert jnp.allclose(z3, z3_r, atol=1e-2, rtol=1e-2)
    assert jnp.allclose(lv3, lv3_r, atol=1e-2, rtol=1e-2)
    assert jnp.allclose(mu3, mu3_r, atol=1e-2, rtol=1e-2)

    print("KERNEL_OK")
</pallas_src>

<mosaic_0001>
module attributes {stable_mosaic.version = 11 : i64} {
  func.func @_vae_encoder_kernel(%arg0: i32, %arg1: memref<8x64xf32, #tpu.memory_space<vmem>>, %arg2: memref<8x128xf32, #tpu.memory_space<vmem>>, %arg3: memref<64x32xf32, #tpu.memory_space<vmem>>, %arg4: memref<1x32xf32, #tpu.memory_space<vmem>>, %arg5: memref<32x32xf32, #tpu.memory_space<vmem>>, %arg6: memref<1x32xf32, #tpu.memory_space<vmem>>, %arg7: memref<32x256xf32, #tpu.memory_space<vmem>>, %arg8: memref<1x256xf32, #tpu.memory_space<vmem>>, %arg9: memref<8x384xf32, #tpu.memory_space<vmem>>) attributes {dimension_semantics = [#tpu.dimension_semantics<parallel>], iteration_bounds = array<i64: 1>, scalar_prefetch = 0 : i64, scratch_operands = 0 : i64, tpu.core_type = #tpu.core_type<tc>, window_params = [{transform_indices = @transform_0, window_bounds = array<i64: 8, 64>}, {transform_indices = @transform_1, window_bounds = array<i64: 8, 128>}, {pipeline_mode = #tpu.pipeline_mode<synchronous>, transform_indices = @transform_2, window_bounds = array<i64: 64, 32>}, {pipeline_mode = #tpu.pipeline_mode<synchronous>, transform_indices = @transform_3, window_bounds = array<i64: 1, 32>}, {pipeline_mode = #tpu.pipeline_mode<synchronous>, transform_indices = @transform_4, window_bounds = array<i64: 32, 32>}, {pipeline_mode = #tpu.pipeline_mode<synchronous>, transform_indices = @transform_5, window_bounds = array<i64: 1, 32>}, {pipeline_mode = #tpu.pipeline_mode<synchronous>, transform_indices = @transform_6, window_bounds = array<i64: 32, 256>}, {pipeline_mode = #tpu.pipeline_mode<synchronous>, transform_indices = @transform_7, window_bounds = array<i64: 1, 256>}, {transform_indices = @transform_8, window_bounds = array<i64: 8, 384>}]} {
    %c0 = arith.constant 0 : index
    %c0_0 = arith.constant 0 : index
    %0 = vector.load %arg1[%c0, %c0_0] : memref<8x64xf32, #tpu.memory_space<vmem>>, vector<8x64xf32>
    %c0_1 = arith.constant 0 : index
    %c0_2 = arith.constant 0 : index
    %1 = vector.load %arg3[%c0_1, %c0_2] : memref<64x32xf32, #tpu.memory_space<vmem>>, vector<64x32xf32>
    %cst = arith.constant dense<0.000000e+00> : vector<8x32xf32>
    %2 = tpu.matmul %0, %1, %cst {dimension_numbers = #tpu.dot_dimension_numbers<[1], [0], [0], [1], [0, 0, 1, 1], [], []>} : vector<8x64xf32>, vector<64x32xf32>, vector<8x32xf32> -> vector<8x32xf32>
    %c0_3 = arith.constant 0 : index
    %c0_4 = arith.constant 0 : index
    %3 = vector.load %arg4[%c0_3, %c0_4] : memref<1x32xf32, #tpu.memory_space<vmem>>, vector<1x32xf32>
    %4 = vector.broadcast %3 : vector<1x32xf32> to vector<8x32xf32>
    %5 = arith.addf %2, %4 : vector<8x32xf32>
    %cst_5 = arith.constant 0.000000e+00 : f32
    %6 = vector.broadcast %cst_5 : f32 to vector<8x32xf32>
    %7 = arith.maximumf %5, %6 : vector<8x32xf32>
    %c0_6 = arith.constant 0 : index
    %c0_7 = arith.constant 0 : index
    %8 = vector.load %arg5[%c0_6, %c0_7] : memref<32x32xf32, #tpu.memory_space<vmem>>, vector<32x32xf32>
    %cst_8 = arith.constant dense<0.000000e+00> : vector<8x32xf32>
    %9 = tpu.matmul %7, %8, %cst_8 {dimension_numbers = #tpu.dot_dimension_numbers<[1], [0], [0], [1], [0, 0, 1, 1], [], []>} : vector<8x32xf32>, vector<32x32xf32>, vector<8x32xf32> -> vector<8x32xf32>
    %c0_9 = arith.constant 0 : index
    %c0_10 = arith.constant 0 : index
    %10 = vector.load %arg6[%c0_9, %c0_10] : memref<1x32xf32, #tpu.memory_space<vmem>>, vector<1x32xf32>
    %11 = vector.broadcast %10 : vector<1x32xf32> to vector<8x32xf32>
    %12 = arith.addf %9, %11 : vector<8x32xf32>
    %c0_11 = arith.constant 0 : index
    %c0_12 = arith.constant 0 : index
    %13 = vector.load %arg7[%c0_11, %c0_12] : memref<32x256xf32, #tpu.memory_space<vmem>>, vector<32x256xf32>
    %cst_13 = arith.constant dense<0.000000e+00> : vector<8x256xf32>
    %14 = tpu.matmul %12, %13, %cst_13 {dimension_numbers = #tpu.dot_dimension_numbers<[1], [0], [0], [1], [0, 0, 1, 1], [], []>} : vector<8x32xf32>, vector<32x256xf32>, vector<8x256xf32> -> vector<8x256xf32>
    %c0_14 = arith.constant 0 : index
    %c0_15 = arith.constant 0 : index
    %15 = vector.load %arg8[%c0_14, %c0_15] : memref<1x256xf32, #tpu.memory_space<vmem>>, vector<1x256xf32>
    %16 = vector.broadcast %15 : vector<1x256xf32> to vector<8x256xf32>
    %17 = arith.addf %14, %16 : vector<8x256xf32>
    %18 = vector.extract_strided_slice %17 {offsets = [0, 0], sizes = [8, 128], strides = [1, 1]} : vector<8x256xf32> to vector<8x128xf32>
    %19 = vector.extract_strided_slice %17 {offsets = [0, 128], sizes = [8, 128], strides = [1, 1]} : vector<8x256xf32> to vector<8x128xf32>
    %cst_16 = arith.constant 5.000000e-01 : f32
    %20 = vector.broadcast %cst_16 : f32 to vector<8x128xf32>
    %21 = arith.mulf %20, %18 : vector<8x128xf32>
    %22 = math.exp %21 : vector<8x128xf32>
    %c0_17 = arith.constant 0 : index
    %c0_18 = arith.constant 0 : index
    %23 = vector.load %arg2[%c0_17, %c0_18] : memref<8x128xf32, #tpu.memory_space<vmem>>, vector<8x128xf32>
    %24 = arith.mulf %23, %22 : vector<8x128xf32>
    %25 = arith.addf %19, %24 : vector<8x128xf32>
    %c0_19 = arith.constant 0 : index
    %c0_20 = arith.constant 0 : index
    %26 = vector.load %arg9[%c0_19, %c0_20] : memref<8x384xf32, #tpu.memory_space<vmem>>, vector<8x128xf32>
    tpu.vector_store %arg9[%c0_19, %c0_20], %25 {strides = array<i32>} : memref<8x384xf32, #tpu.memory_space<vmem>>, vector<8x128xf32>,
    %c0_21 = arith.constant 0 : index
    %c128 = arith.constant 128 : index
    %27 = vector.load %arg9[%c0_21, %c128] : memref<8x384xf32, #tpu.memory_space<vmem>>, vector<8x256xf32>
    tpu.vector_store %arg9[%c0_21, %c128], %17 {strides = array<i32>} : memref<8x384xf32, #tpu.memory_space<vmem>>, vector<8x256xf32>,
    return
  }
  func.func @transform_0(%arg0: i32) -> (i32, i32) {
    %c0_i32 = arith.constant 0 : i32
    %c0_i32_0 = arith.constant 0 : i32
    return %arg0, %c0_i32 : i32, i32
  }
  func.func @transform_1(%arg0: i32) -> (i32, i32) {
    %c0_i32 = arith.constant 0 : i32
    %c0_i32_0 = arith.constant 0 : i32
    return %arg0, %c0_i32 : i32, i32
  }
  func.func @transform_2(%arg0: i32) -> (i32, i32) {
    %c0_i32 = arith.constant 0 : i32
    %c0_i32_0 = arith.constant 0 : i32
    %c0_i32_1 = arith.constant 0 : i32
    return %c0_i32, %c0_i32_0 : i32, i32
  }
  func.func @transform_3(%arg0: i32) -> (i32, i32) {
    %c0_i32 = arith.constant 0 : i32
    %c0_i32_0 = arith.constant 0 : i32
    %c0_i32_1 = arith.constant 0 : i32
    return %c0_i32, %c0_i32_0 : i32, i32
  }
  func.func @transform_4(%arg0: i32) -> (i32, i32) {
    %c0_i32 = arith.constant 0 : i32
    %c0_i32_0 = arith.constant 0 : i32
    %c0_i32_1 = arith.constant 0 : i32
    return %c0_i32, %c0_i32_0 : i32, i32
  }
  func.func @transform_5(%arg0: i32) -> (i32, i32) {
    %c0_i32 = arith.constant 0 : i32
    %c0_i32_0 = arith.constant 0 : i32
    %c0_i32_1 = arith.constant 0 : i32
    return %c0_i32, %c0_i32_0 : i32, i32
  }
  func.func @transform_6(%arg0: i32) -> (i32, i32) {
    %c0_i32 = arith.constant 0 : i32
    %c0_i32_0 = arith.constant 0 : i32
    %c0_i32_1 = arith.constant 0 : i32
    return %c0_i32, %c0_i32_0 : i32, i32
  }
  func.func @transform_7(%arg0: i32) -> (i32, i32) {
    %c0_i32 = arith.constant 0 : i32
    %c0_i32_0 = arith.constant 0 : i32
    %c0_i32_1 = arith.constant 0 : i32
    return %c0_i32, %c0_i32_0 : i32, i32
  }
  func.func @transform_8(%arg0: i32) -> (i32, i32) {
    %c0_i32 = arith.constant 0 : i32
    %c0_i32_0 = arith.constant 0 : i32
    return %arg0, %c0_i32 : i32, i32
  }
}

</mosaic_0001>

<bundles_post_ra>
// kernel: tpu_custom_call.1
= control target key start
LH: loop header
LB: loop body
LE: loop exit
PB: predicated region body
PF: predicated region fallthrough
CT: control target
= control target key end

     0   :  { %13 = vsyncpa [#allocation3], 0  ;;  %s427_s0 = inlined_call_operand.hbm [shape: f32[8,64], index: 0, kind: input, shape index: {}]   ;;  %s428_s1 = inlined_call_operand.hbm [shape: f32[8,128], index: 1, kind: input, shape index: {}]   ;;  %s429_s2 = inlined_call_operand.vmem [shape: f32[64,32], index: 2, kind: input, shape index: {}]   ;;  %s430_s3 = inlined_call_operand.vmem [shape: f32[1,32], index: 3, kind: input, shape index: {}]   ;;  %s431_s4 = inlined_call_operand.vmem [shape: f32[32,32], index: 4, kind: input, shape index: {}]   ;;  %s432_s5 = inlined_call_operand.vmem [shape: f32[1,32], index: 5, kind: input, shape index: {}]   ;;  %s433_s6 = inlined_call_operand.vmem [shape: f32[32,256], index: 6, kind: input, shape index: {}]   ;;  %s434_s7 = inlined_call_operand.vmem [shape: f32[1,256], index: 7, kind: input, shape index: {}]   ;;  %s435_s8 = inlined_call_operand.hbm [shape: f32[8,384], index: 8, kind: output, shape index: {}]  }
   0x1   :  { %14 = vsyncpa [#allocation6], 0 }
   0x2   :  { %15 = vsyncpa [#allocation4], 0  ;;  %s21_s29 = sshll.u32 %s427_s0, 4  ;;  %s301_s30 = smov [#allocation2]   ;;  %s22_s29 = int_to_ptr.hbm [resolvable:$true] %s21_s29 }
   0x3   :  { %s23_s9 = sshll.u32 %s301_s30, 4  ;;  %s32_s12 = sshll.u32 %s428_s1, 4  ;;  %s24_s9 = int_to_ptr.vmem [resolvable:$true] %s23_s9  ;;  %s33_s12 = int_to_ptr.hbm [resolvable:$true] %s32_s12 }
   0x4   :  { %26 = dma.hbm_to_vmem [thread:$0]  %s22_s29, 128, %s24_s9, [#allocation3]  }
   0x5   :  { %s302_s13 = smov [#allocation5]  }
   0x6   :  { %s34_s14 = sshll.u32 %s302_s13, 4  ;;  %s35_s14 = int_to_ptr.vmem [resolvable:$true] %s34_s14 }
   0x7   :  { %37 = dma.hbm_to_vmem [thread:$0]  %s33_s12, 128, %s35_s14, [#allocation6]  }
   0x8   :  { %295 = dma.done.wait [#allocation3], 128  }
   0x9   :  { %296 = vsyncadd [#allocation3], 4294967168 }
   0xa   :  { %297 = dma.done.wait [#allocation6], 128  }
   0xb   :  { %298 = vsyncadd [#allocation6], 4294967168  ;;  %v66_v0 = vld [vmem:[%s429_s2 + $0x38] sm:$0xff]  ;;  %v65_v1 = vld [vmem:[%s429_s2 + $0x30] sm:$0xff]  ;;  %vm71_vm0 = vcmask 523264   ;;  %vm104_vm1 = vcmask 261120  }
   0xc   :  { %83 = vmatpush.msra.mxu0 %v66_v0  ;;  %v64_v2 = vld [vmem:[%s429_s2 + $0x28] sm:$0xff]  ;;  %v99_v3 = vld [vmem:[%s431_s4 + $0x18] sm:$0xff]  ;;  %v63_v4 = vld [vmem:[%s429_s2 + $0x20] sm:$0xff]  ;;  %s201_s12 = sshll.u32 %s435_s8, 4  ;;  %s202_s12 = int_to_ptr.hbm [resolvable:$true] %s201_s12 }
   0xd   :  { %120 = vmatpush.msra.mxu1 %v99_v3  ;;  %v62_v5 = vld [vmem:[%s429_s2 + $0x18] sm:$0xff]  ;;  %v61_v6 = vld [vmem:[%s429_s2 + $0x10] sm:$0xff]  ;;  %v60_v7 = vld [vmem:[%s429_s2 + $0x8] sm:$0xff] }
   0xe   :  { %84 = vmatpush.msra.mxu0 %v65_v1  ;;  %v59_v8 = vld [vmem:[%s429_s2] sm:$0xff]  ;;  %v98_v10 = vld [vmem:[%s431_s4 + $0x10] sm:$0xff]  ;;  %v97_v11 = vld [vmem:[%s431_s4 + $0x8] sm:$0xff] }
   0xf   :  { %v58_v9 = vld [vmem:[#allocation2] sm:$0xff]  ;;  %121 = vmatpush.msra.mxu1 %v98_v10  ;;  %v134_v13 = vld [vmem:[%s433_s6 + $0x30] sm:$0xff]  ;;  %v135_v14 = vld [vmem:[%s433_s6 + $0x38] sm:$0xff] }
  0x10   :  { %85 = vmatpush.msra.mxu0 %v64_v2  ;;  %v96_v12 = vld [vmem:[%s431_s4] sm:$0xff]  ;;  %157 = vmatpush.msra.mxu2 %v134_v13  ;;  %v133_v16 = vld [vmem:[%s433_s6 + $0x28] sm:$0xff]  ;;  %v130_v21 = vld [vmem:[%s433_s6 + $0x10] sm:$0xff] }
  0x11   :  { %122 = vmatpush.msra.mxu1 %v97_v11  ;;  %v132_v15 = vld [vmem:[%s433_s6 + $0x20] sm:$0xff]  ;;  %177 = vmatpush.msra.mxu3 %v135_v14  ;;  %v131_v22 = vld [vmem:[%s433_s6 + $0x18] sm:$0xff]  ;;  %v129_v24 = vld [vmem:[%s433_s6 + $0x8] sm:$0xff] }
  0x12   :  { %86 = vmatpush.msra.mxu0 %v63_v4  ;;  %158 = vmatpush.msra.mxu2 %v132_v15  ;;  %v219_v17 = vld [vmem:[%s430_s3] ss:$0 sm:$0xff]  ;;  %v188_v37 = vld [vmem:[#allocation5] sm:$0xff] }
  0x13   :  { %123 = vmatpush.msra.mxu1 %v96_v12  ;;  %178 = vmatpush.msra.mxu3 %v133_v16  ;;  %v128_v23 = vld [vmem:[%s433_s6] sm:$0xff] }
  0x14   :  { %87 = vmatpush.msra.mxu0 %v62_v5  ;;  %159 = vmatpush.msra.mxu2 %v130_v21  ;;  %v220_v25 = vld [vmem:[%s432_s5] ss:$0 sm:$0xff]  ;;  %s303_s5 = smov [#allocation7]  }
  0x15   :  { %179 = vmatpush.msra.mxu3 %v131_v22  ;;  %v136_v28 = vld [vmem:[%s434_s7] sm:$0x3]  ;;  %s199_s6 = sshll.u32 %s303_s5, 4  ;;  %s200_s6 = int_to_ptr.vmem [resolvable:$true] %s199_s6 }
  0x16   :  { %88 = vmatpush.msra.mxu0 %v61_v6  ;;  %160 = vmatpush.msra.mxu2 %v128_v23  ;;  %v138_v29 = vperm.slane %v136_v28, 0  ;;  %v139_v30 = vperm.slane %v136_v28, 1 }
  0x17   :  { %180 = vmatpush.msra.mxu3 %v129_v24 }
  0x18   :  { %89 = vmatpush.msra.mxu0 %v60_v7 }
  0x1a   :  { %90 = vmatpush.msra.mxu0 %v59_v8 }
  0x1b   :  { %212 = vmatmul.msk.f32.vlgmr.msra.gmra.mxu0 %vm71_vm0, %v58_v9 }
  0x98   :  { %v92_v18 = vpop.f32.mrf.mxu0 }
  0x99   :  { %v93_v19 = vadd.f32 %v219_v17, %v92_v18 }
  0x9b   :  { %v95_v20 = vmax.f32 %v93_v19, 0.0 }
  0x9d   :  { %213 = vmatmul.msk.f32.vlgmr.msra.gmra.mxu1 %vm104_vm1, %v95_v20 }
 0x11a   :  { %v125_v26 = vpop.f32.mrf.mxu1 }
 0x11b   :  { %v126_v27 = vadd.f32 %v220_v25, %v125_v26 }
 0x11d   :  { %214 = vmatmul.msk.f32.vlgmr.msra.gmra.mxu2 %vm104_vm1, %v126_v27  ;;  %215 = vmatmul.msk.f32.vlgmr.msra.gmra.mxu3 %vm104_vm1, %v126_v27 }
 0x1a0   :  { %v162_v31 = vpop.f32.mrf.mxu2  ;;  %v182_v32 = vpop.f32.mrf.mxu3 }
 0x1a1   :  { %v163_v33 = vadd.f32 %v162_v31, %v138_v29  ;;  %v183_v34 = vadd.f32 %v182_v32, %v139_v30 }
 0x1a3   :  { %v185_v35 = vmul.f32 0.5, %v163_v33  ;;  %192 = vst [vmem:[#allocation7 + $0x8] sm:$0xff] %v163_v33 }
 0x1a4   :  { %193 = vst [vmem:[#allocation7 + $0x10] sm:$0xff] %v183_v34 }
 0x1a5   :  { %v186_v36 = vmul.f32 1.442695, %v185_v35 }
 0x1a7   :  { %221 = vpow2.f32 %v186_v36 }
 0x1ad   :  { %v222_v38 = vpop.eup %221 }
 0x1ae   :  { %v189_v39 = vmul.f32 %v222_v38, %v188_v37 }
 0x1b0   :  { %v190_v40 = vadd.f32 %v189_v39, %v183_v34 }
 0x1b2   :  { %191 = vst [vmem:[#allocation7] sm:$0xff] %v190_v40 }
 0x1b3   :  { %204 = dma.vmem_to_hbm [thread:$0]  %s200_s6, 384, %s202_s12, [#allocation4]  }
 0x1b4   :  { %299 = dma.done.wait [#allocation4], 384  }
 0x1b5   :  { %300 = vsyncadd [#allocation4], 4294966912 }
 0x1b6   :  { %209 = vsyncpa [#allocation3], 1 }
 0x1b7   :  { %210 = vsyncpa [#allocation6], 1 }
 0x1b8   :  { %211 = vsyncpa [#allocation4], 1 }

</bundles_post_ra>
